<compile_context>
chip_gen: v6e
topology: v6e:2x2x1
jax: 0.10.0
libtpu: 0.0.40
codegen_flags: <defaults>
</compile_context>

<pallas_src>
import jax
import jax.numpy as jnp
from jax.experimental import pallas as pl
from jax.experimental.pallas import tpu as pltpu


def _ones_kernel(x_hbm_ref, o_ref):
    # Reference module ignores the input values entirely.  x arrives as a raw
    # HBM ref (memory_space=pl.ANY), so no HBM->VMEM copy is ever issued.
    del x_hbm_ref
    o_ref[...] = jnp.ones_like(o_ref)


def dummy_enc(x: jax.Array, hidden_dim: int) -> jax.Array:
    """Pallas implementation of DummyEnc.forward.

    Args:
      x: input array (NCHW or anything else) — only x.shape[0] is used.
      hidden_dim: output feature width.

    Returns:
      (B, hidden_dim) float32 array of ones.
    """
    b = x.shape[0]
    total = b * hidden_dim

    # Pick a lane-dense fill layout so stores are unmasked full-vreg vst:
    #   - hidden_dim already a multiple of 128  -> fill (B, hidden_dim) directly
    #   - otherwise, if B*hidden_dim is a 128-multiple -> fill a flat
    #     (total/128, 128) slab and reshape back (free, row-major contiguous)
    #   - otherwise (tiny / ragged) -> fill (B, hidden_dim) as a full-array
    #     block (legal via the full-dims exception to the (8, 128) rule).
    if hidden_dim % 128 == 0:
        fill_shape = (b, hidden_dim)
    elif total % 128 == 0:
        fill_shape = (total // 128, 128)
    else:
        fill_shape = (b, hidden_dim)

    n_rows, n_cols = fill_shape

    # Row tiling: ~2 MiB f32 blocks, multiple of 8 sublanes.  Keeps
    # double-buffered output blocks far below v7x's 64 MiB VMEM while being
    # large enough to amortize the ~0.35 us/step grid overhead.
    target_block_bytes = 2 * 1024 * 1024
    rows_per_block = max(8, target_block_bytes // (n_cols * 4))
    rows_per_block = (rows_per_block // 8) * 8
    if n_rows <= rows_per_block:
        tb = n_rows            # single block == full array: always legal
    else:
        tb = rows_per_block    # multiple of 8: legal sublane tiling

    grid = (pl.cdiv(n_rows, tb),)

    filled = pl.pallas_call(
        _ones_kernel,
        out_shape=jax.ShapeDtypeStruct(fill_shape, jnp.float32),
        grid=grid,
        in_specs=[pl.BlockSpec(memory_space=pl.ANY)],   # unused input: no DMA
        out_specs=pl.BlockSpec((tb, n_cols), lambda i: (i, 0)),
        compiler_params=pltpu.CompilerParams(
            dimension_semantics=("parallel",),
        ),
        cost_estimate=pl.CostEstimate(
            flops=0, transcendentals=0, bytes_accessed=total * 4),
    )(x)

    if fill_shape != (b, hidden_dim):
        filled = filled.reshape(b, hidden_dim)
    return filled


if __name__ == "__main__":
    key = jax.random.PRNGKey(0)

    # Primary check: small NCHW input consistent with a typical encoder input.
    x = jax.random.normal(key, (2, 4, 16, 16), dtype=jnp.float32)
    hidden_dim = 32

    out = dummy_enc(x, hidden_dim)
    out = jax.block_until_ready(out)

    expected = jnp.ones((x.shape[0], hidden_dim), dtype=jnp.float32)
    assert out.shape == (2, hidden_dim), out.shape
    assert out.dtype == jnp.float32, out.dtype
    assert bool(jnp.all(out == expected)), "output mismatch"

    # Secondary check: exercises the lane-dense (rows, 128) fill path
    # (B * hidden_dim divisible by 128 while hidden_dim is not).
    x2 = jax.random.normal(key, (64, 4, 8, 8), dtype=jnp.float32)
    out2 = jax.block_until_ready(dummy_enc(x2, hidden_dim))
    expected2 = jnp.ones((64, hidden_dim), dtype=jnp.float32)
    assert out2.shape == (64, hidden_dim), out2.shape
    assert bool(jnp.all(out2 == expected2)), "lane-dense path mismatch"

    print("KERNEL_OK")
</pallas_src>

<mosaic_0001>
module attributes {stable_mosaic.version = 11 : i64} {
  func.func @_ones_kernel(%arg0: i32, %arg1: memref<2x4x16x16xf32, #tpu.memory_space<any>>, %arg2: memref<2x32xf32, #tpu.memory_space<vmem>>) attributes {dimension_semantics = [#tpu.dimension_semantics<parallel>], iteration_bounds = array<i64: 1>, scalar_prefetch = 0 : i64, scratch_operands = 0 : i64, tpu.core_type = #tpu.core_type<tc>, window_params = [{}, {transform_indices = @transform_1, window_bounds = array<i64: 2, 32>}]} {
    %cst = arith.constant 1.000000e+00 : f32
    %0 = vector.broadcast %cst : f32 to vector<2x32xf32>
    %c0 = arith.constant 0 : index
    %c0_0 = arith.constant 0 : index
    %1 = vector.load %arg2[%c0, %c0_0] : memref<2x32xf32, #tpu.memory_space<vmem>>, vector<2x32xf32>
    tpu.vector_store %arg2[%c0, %c0_0], %0 {strides = array<i32>} : memref<2x32xf32, #tpu.memory_space<vmem>>, vector<2x32xf32>,
    return
  }
  func.func @transform_1(%arg0: i32) -> (i32, i32) {
    %c0_i32 = arith.constant 0 : i32
    %c0_i32_0 = arith.constant 0 : i32
    return %arg0, %c0_i32 : i32, i32
  }
}

</mosaic_0001>

<bundles_post_ra>
// kernel: tpu_custom_call.1
= control target key start
LH: loop header
LB: loop body
LE: loop exit
PB: predicated region body
PF: predicated region fallthrough
CT: control target
= control target key end

     0   :  { %vm7_vm0 = vcmask 254976   ;;  %s62_s0 = inlined_call_operand.hbm [shape: f32[2,4,16,16], index: 0, kind: input, shape index: {}]   ;;  %s63_s1 = inlined_call_operand.hbm [shape: f32[2,32], index: 1, kind: output, shape index: {}]  }
   0x1   :  { %6 = vsyncpa [#allocation3], 0  ;;  %v47_v0 = vmov 1.0   ;;  %s48_s6 = smov [#allocation2]  }
   0x2   :  { %8 = vst.msk [vmem:[#allocation2] sm:$0x3] %vm7_vm0, %v47_v0  ;;  %s15_s7 = sshll.u32 %s48_s6, 4  ;;  %s16_s7 = int_to_ptr.vmem [resolvable:$true] %s15_s7 }
   0x3   :  { %s25_s8 = scalar_lea.vmem %s16_s7, 32  ;;  %p30_p1 = scmp.lt.s32.totalorder %s16_s7, %s16_s7 }
   0x4   :  { %p26_p0 = scmp.ne.s32.totalorder %s16_s7, %s25_s8  ;;  %p31_p2 = scmp.lt.s32.totalorder %s25_s8, %s25_s8 }
   0x6   :  { %p32_p3 = por %p31_p2, %p30_p1 }
   0x8   :  { %p33_p4 = pnand %p32_p3, %p26_p0 }
   0xa   :  { %36 = shalt.err (!%p33_p4)
}
   0xb   :  { %18 = dma.vmem_to_hbm [thread:$0]  %s16_s7, 32, %s63_s1, [#allocation3]  }
   0xc   :  { %45 = dma.done.wait [#allocation3], 32  }
   0xd   :  { %46 = vsyncadd [#allocation3], 4294967264 }
   0xe   :  { %22 = vsyncpa [#allocation3], 1 }

</bundles_post_ra>
